<compile_context>
chip_gen: v6e
topology: v6e:2x2x1
jax: 0.10.0
libtpu: 0.0.40
codegen_flags: <defaults>
</compile_context>

<pallas_src>
import jax
import jax.numpy as jnp
from jax.experimental import pallas as pl
from jax.experimental.pallas import tpu as pltpu


def _round_up(a, b):
    return ((a + b - 1) // b) * b


def _make_deconv_kernel(Cin, Cout, W, kh, kw, pad, M, chunk):
    n_chunks = -(-M // chunk)

    def kernel(w_ref, mask_ref, g_ref, o_ref):
        # w_ref:    (kh*kw, Cout, Cin) bf16  -- per-tap equivalent-conv weights (resident)
        # mask_ref: (kw, chunk)        bf16  -- horizontal border masks, periodic in W (resident)
        # g_ref:    (Cin, L)           bf16  -- vertically padded, flattened, end-padded x[n]
        # o_ref:    (Cout, M)          f32   -- flattened NCHW output for sample n
        for c in range(n_chunks):                        # static, unrolled chunking
            m0 = c * chunk
            tm = min(chunk, M - m0)                      # static; multiple of W
            acc = jnp.zeros((Cout, tm), jnp.float32)
            for ey in range(kh):
                for ex in range(kw):
                    base = m0 + ey * W + ex              # static offset into g
                    rhs = g_ref[:, base:base + tm]       # (Cin, tm) bf16, direct slice
                    if ex != pad:                        # taps that cross the L/R border
                        rhs = rhs * mask_ref[ex:ex + 1, :tm]
                    acc = acc + jnp.dot(w_ref[ey * kw + ex], rhs,
                                        preferred_element_type=jnp.float32)
            o_ref[:, m0:m0 + tm] = acc                   # lane-dense store

    return kernel


def deconv_block_last(x, weight, *, chunk_m=8192):
    """Forward of PyTorch DeConvBlock_last.

    x:      [N, Cin, H, W]           (NCHW, float32)
    weight: [Cin, Cout, kh, kw]      (PyTorch ConvTranspose2d layout)
    returns [N, Cout, H, W] float32  (stride=1, padding=k//2, odd k => same spatial size)
    """
    N, Cin, H, W = x.shape
    Cin_w, Cout, kh, kw = weight.shape
    assert Cin == Cin_w
    assert kh == kw, "DeConvBlock_last uses a square kernel"
    assert kh % 2 == 1, "flat-slice formulation assumes an odd kernel (e.g. 3)"
    # TODO(synk): even-kernel support (output shrinks by 1) needs a windowed/reshape path.
    pad = kh // 2                 # module padding == equivalent-conv padding for odd k
    M = H * W                     # flattened per-sample output size (lane axis)
    L = (H + 2 * pad) * W + 2 * pad

    # Per-tap equivalent-conv weights: w_taps[ey*kw+ex, co, ci] = weight[ci, co, kh-1-ey, kw-1-ex]
    w_taps = (jnp.flip(weight, axis=(2, 3))
              .transpose(2, 3, 1, 0)                 # (kh, kw, Cout, Cin)
              .reshape(kh * kw, Cout, Cin)
              .astype(jnp.bfloat16))

    # Input stream: bf16 first (halves pad traffic), vertical zero-pad by `pad`, free
    # row-major flatten of (y, x), then `pad` zeros at both ends so every tap's shifted
    # slice stays in bounds.  No im2col anywhere.
    g = jnp.pad(x.astype(jnp.bfloat16), ((0, 0), (0, 0), (pad, pad), (0, 0)))
    g = g.reshape(N, Cin, (H + 2 * pad) * W)
    g = jnp.pad(g, ((0, 0), (0, 0), (pad, pad)))     # (N, Cin, L)

    # In-kernel chunk over the flattened M axis: large (amortizes per-chunk overhead),
    # a multiple of W so one periodic border mask serves every chunk.
    chunk = max(W, (min(chunk_m, M) // W) * W)

    # Horizontal border masks (periodic in W): column x of a row is valid for tap ex iff
    # 0 <= x + ex - pad < W.  Tiny resident bf16 array; avoids per-tap iota/mod in-kernel.
    cols = jnp.arange(chunk, dtype=jnp.int32) % W
    ex_ids = jnp.arange(kw, dtype=jnp.int32)[:, None]
    edge_mask = ((cols[None, :] >= pad - ex_ids)
                 & (cols[None, :] < W + pad - ex_ids)).astype(jnp.bfloat16)   # (kw, chunk)

    # Rough per-grid-step VMEM (double-buffered blocks, padded layouts, live temps).
    vmem_est = (2 * _round_up(Cin, 16) * _round_up(L, 128) * 2          # g block
                + 2 * _round_up(Cout, 8) * _round_up(M, 128) * 4        # out block
                + kh * kw * 16 * 128 * 2                                # weights
                + _round_up(kw, 16) * _round_up(chunk, 128) * 2         # masks
                + 4 * chunk * (_round_up(Cin, 16) * 2 + _round_up(Cout, 8) * 4))  # temps
    assert vmem_est < 40 * 1024 * 1024, (
        "per-sample blocks too large for VMEM; add an M-tiled grid axis")
    # TODO(synk): for very large images (or N == 1 on v7x) add a second "parallel" grid
    # axis over M-tiles (halo handled by overlapping flat slices) instead of whole-sample
    # blocks.

    kernel = _make_deconv_kernel(Cin, Cout, W, kh, kw, pad, M, chunk)

    y = pl.pallas_call(
        kernel,
        out_shape=jax.ShapeDtypeStruct((N, Cout, M), jnp.float32),
        grid=(N,),
        in_specs=[
            pl.BlockSpec((kh * kw, Cout, Cin), lambda n: (0, 0, 0)),   # resident
            pl.BlockSpec((kw, chunk), lambda n: (0, 0)),               # resident
            pl.BlockSpec((None, Cin, L), lambda n: (n, 0, 0)),         # per-sample, pipelined
        ],
        out_specs=pl.BlockSpec((None, Cout, M), lambda n: (n, 0, 0)),  # lane-dense
        compiler_params=pltpu.CompilerParams(
            dimension_semantics=("parallel",),       # samples shard across v7x's 2 TCs
            vmem_limit_bytes=40 * 1024 * 1024,       # < v7x 64 MiB physical; fine on v5e/v6e
        ),
    )(w_taps, edge_mask, g)

    # Free reshape (m = y*W + x is exactly NCHW row-major); no post-kernel transpose pass.
    return y.reshape(N, Cout, H, W)


def reference_deconv(x, weight, pad):
    """Scatter-form definition of ConvTranspose2d(stride=1, padding=pad, bias=False)."""
    Cin, Cout, kh, kw = weight.shape
    N, _, H, W = x.shape
    full = jnp.zeros((N, Cout, H + kh - 1, W + kw - 1), jnp.float32)
    for dy in range(kh):
        for dx in range(kw):
            contrib = jnp.einsum("ncyx,cq->nqyx", x, weight[:, :, dy, dx])
            full = full.at[:, :, dy:dy + H, dx:dx + W].add(contrib)
    Ho = H + kh - 1 - 2 * pad
    Wo = W + kw - 1 - 2 * pad
    return full[:, :, pad:pad + Ho, pad:pad + Wo]


if __name__ == "__main__":
    # DeConvBlock_last(in_size=4, out_size=8, kernel=3)
    N, Cin, H, W = 2, 4, 16, 16
    Cout, kh = 8, 3
    pad = kh // 2

    key = jax.random.PRNGKey(0)
    kx, kw_ = jax.random.split(key, 2)
    x = jax.random.normal(kx, (N, Cin, H, W), dtype=jnp.float32)
    # PyTorch ConvTranspose2d weight layout: [in_channels, out_channels, kh, kw]
    weight = jax.random.normal(kw_, (Cin, Cout, kh, kh), dtype=jnp.float32) * 0.1

    fn = jax.jit(deconv_block_last)
    out = jax.block_until_ready(fn(x, weight))

    ref = reference_deconv(x, weight, pad)
    assert out.shape == ref.shape == (N, Cout, H, W), (out.shape, ref.shape)
    max_err = float(jnp.abs(out - ref).max())
    # bf16 MXU inputs with f32 accumulation: ~1e-2 relative error expected/accepted.
    assert jnp.allclose(out, ref, atol=3e-2, rtol=3e-2), max_err

    print("KERNEL_OK")
</pallas_src>

<mosaic_0001>
module attributes {stable_mosaic.version = 11 : i64} {
  func.func @kernel(%arg0: i32, %arg1: memref<9x8x4xbf16, #tpu.memory_space<vmem>>, %arg2: memref<3x256xbf16, #tpu.memory_space<vmem>>, %arg3: memref<1x4x290xbf16, #tpu.memory_space<vmem>>, %arg4: memref<1x8x256xf32, #tpu.memory_space<vmem>>) attributes {dimension_semantics = [#tpu.dimension_semantics<parallel>], iteration_bounds = array<i64: 2>, scalar_prefetch = 0 : i64, scratch_operands = 0 : i64, tpu.core_type = #tpu.core_type<tc>, window_params = [{pipeline_mode = #tpu.pipeline_mode<synchronous>, transform_indices = @transform_0, window_bounds = array<i64: 9, 8, 4>}, {pipeline_mode = #tpu.pipeline_mode<synchronous>, transform_indices = @transform_1, window_bounds = array<i64: 3, 256>}, {transform_indices = @transform_2, window_bounds = array<i64: 1, 4, 290>}, {transform_indices = @transform_3, window_bounds = array<i64: 1, 8, 256>}]} {
    %cst = arith.constant 0.000000e+00 : f32
    %0 = vector.broadcast %cst : f32 to vector<8x256xf32>
    %c0 = arith.constant 0 : index
    %c0_0 = arith.constant 0 : index
    %c0_1 = arith.constant 0 : index
    %1 = vector.load %arg3[%c0, %c0_0, %c0_1] : memref<1x4x290xbf16, #tpu.memory_space<vmem>>, vector<1x4x256xbf16>
    %2 = vector.shape_cast %1 : vector<1x4x256xbf16> to vector<4x256xbf16>
    %c0_2 = arith.constant 0 : index
    %c0_3 = arith.constant 0 : index
    %3 = vector.load %arg2[%c0_2, %c0_3] : memref<3x256xbf16, #tpu.memory_space<vmem>>, vector<1x256xbf16>
    %4 = vector.broadcast %3 : vector<1x256xbf16> to vector<4x256xbf16>
    %5 = arith.mulf %2, %4 : vector<4x256xbf16>
    %c0_4 = arith.constant 0 : index
    %c0_5 = arith.constant 0 : index
    %c0_6 = arith.constant 0 : index
    %6 = vector.load %arg1[%c0_4, %c0_5, %c0_6] : memref<9x8x4xbf16, #tpu.memory_space<vmem>>, vector<1x8x4xbf16>
    %7 = vector.shape_cast %6 : vector<1x8x4xbf16> to vector<8x4xbf16>
    %cst_7 = arith.constant dense<0.000000e+00> : vector<8x256xf32>
    %8 = tpu.matmul %7, %5, %cst_7 {dimension_numbers = #tpu.dot_dimension_numbers<[1], [0], [0], [1], [0, 0, 1, 1], [], []>} : vector<8x4xbf16>, vector<4x256xbf16>, vector<8x256xf32> -> vector<8x256xf32>
    %9 = arith.addf %0, %8 : vector<8x256xf32>
    %c0_8 = arith.constant 0 : index
    %c0_9 = arith.constant 0 : index
    %c1 = arith.constant 1 : index
    %10 = vector.load %arg3[%c0_8, %c0_9, %c1] : memref<1x4x290xbf16, #tpu.memory_space<vmem>>, vector<1x4x256xbf16>
    %11 = vector.shape_cast %10 : vector<1x4x256xbf16> to vector<4x256xbf16>
    %c1_10 = arith.constant 1 : index
    %c0_11 = arith.constant 0 : index
    %c0_12 = arith.constant 0 : index
    %12 = vector.load %arg1[%c1_10, %c0_11, %c0_12] : memref<9x8x4xbf16, #tpu.memory_space<vmem>>, vector<1x8x4xbf16>
    %13 = vector.shape_cast %12 : vector<1x8x4xbf16> to vector<8x4xbf16>
    %cst_13 = arith.constant dense<0.000000e+00> : vector<8x256xf32>
    %14 = tpu.matmul %13, %11, %cst_13 {dimension_numbers = #tpu.dot_dimension_numbers<[1], [0], [0], [1], [0, 0, 1, 1], [], []>} : vector<8x4xbf16>, vector<4x256xbf16>, vector<8x256xf32> -> vector<8x256xf32>
    %15 = arith.addf %9, %14 : vector<8x256xf32>
    %c0_14 = arith.constant 0 : index
    %c0_15 = arith.constant 0 : index
    %c2 = arith.constant 2 : index
    %16 = vector.load %arg3[%c0_14, %c0_15, %c2] : memref<1x4x290xbf16, #tpu.memory_space<vmem>>, vector<1x4x256xbf16>
    %17 = vector.shape_cast %16 : vector<1x4x256xbf16> to vector<4x256xbf16>
    %c2_16 = arith.constant 2 : index
    %c0_17 = arith.constant 0 : index
    %18 = vector.load %arg2[%c2_16, %c0_17] : memref<3x256xbf16, #tpu.memory_space<vmem>>, vector<1x256xbf16>
    %19 = vector.broadcast %18 : vector<1x256xbf16> to vector<4x256xbf16>
    %20 = arith.mulf %17, %19 : vector<4x256xbf16>
    %c2_18 = arith.constant 2 : index
    %c0_19 = arith.constant 0 : index
    %c0_20 = arith.constant 0 : index
    %21 = vector.load %arg1[%c2_18, %c0_19, %c0_20] : memref<9x8x4xbf16, #tpu.memory_space<vmem>>, vector<1x8x4xbf16>
    %22 = vector.shape_cast %21 : vector<1x8x4xbf16> to vector<8x4xbf16>
    %cst_21 = arith.constant dense<0.000000e+00> : vector<8x256xf32>
    %23 = tpu.matmul %22, %20, %cst_21 {dimension_numbers = #tpu.dot_dimension_numbers<[1], [0], [0], [1], [0, 0, 1, 1], [], []>} : vector<8x4xbf16>, vector<4x256xbf16>, vector<8x256xf32> -> vector<8x256xf32>
    %24 = arith.addf %15, %23 : vector<8x256xf32>
    %c0_22 = arith.constant 0 : index
    %c0_23 = arith.constant 0 : index
    %c16 = arith.constant 16 : index
    %25 = vector.load %arg3[%c0_22, %c0_23, %c16] : memref<1x4x290xbf16, #tpu.memory_space<vmem>>, vector<1x4x256xbf16>
    %26 = vector.shape_cast %25 : vector<1x4x256xbf16> to vector<4x256xbf16>
    %c0_24 = arith.constant 0 : index
    %c0_25 = arith.constant 0 : index
    %27 = vector.load %arg2[%c0_24, %c0_25] : memref<3x256xbf16, #tpu.memory_space<vmem>>, vector<1x256xbf16>
    %28 = vector.broadcast %27 : vector<1x256xbf16> to vector<4x256xbf16>
    %29 = arith.mulf %26, %28 : vector<4x256xbf16>
    %c3 = arith.constant 3 : index
    %c0_26 = arith.constant 0 : index
    %c0_27 = arith.constant 0 : index
    %30 = vector.load %arg1[%c3, %c0_26, %c0_27] : memref<9x8x4xbf16, #tpu.memory_space<vmem>>, vector<1x8x4xbf16>
    %31 = vector.shape_cast %30 : vector<1x8x4xbf16> to vector<8x4xbf16>
    %cst_28 = arith.constant dense<0.000000e+00> : vector<8x256xf32>
    %32 = tpu.matmul %31, %29, %cst_28 {dimension_numbers = #tpu.dot_dimension_numbers<[1], [0], [0], [1], [0, 0, 1, 1], [], []>} : vector<8x4xbf16>, vector<4x256xbf16>, vector<8x256xf32> -> vector<8x256xf32>
    %33 = arith.addf %24, %32 : vector<8x256xf32>
    %c0_29 = arith.constant 0 : index
    %c0_30 = arith.constant 0 : index
    %c17 = arith.constant 17 : index
    %34 = vector.load %arg3[%c0_29, %c0_30, %c17] : memref<1x4x290xbf16, #tpu.memory_space<vmem>>, vector<1x4x256xbf16>
    %35 = vector.shape_cast %34 : vector<1x4x256xbf16> to vector<4x256xbf16>
    %c4 = arith.constant 4 : index
    %c0_31 = arith.constant 0 : index
    %c0_32 = arith.constant 0 : index
    %36 = vector.load %arg1[%c4, %c0_31, %c0_32] : memref<9x8x4xbf16, #tpu.memory_space<vmem>>, vector<1x8x4xbf16>
    %37 = vector.shape_cast %36 : vector<1x8x4xbf16> to vector<8x4xbf16>
    %cst_33 = arith.constant dense<0.000000e+00> : vector<8x256xf32>
    %38 = tpu.matmul %37, %35, %cst_33 {dimension_numbers = #tpu.dot_dimension_numbers<[1], [0], [0], [1], [0, 0, 1, 1], [], []>} : vector<8x4xbf16>, vector<4x256xbf16>, vector<8x256xf32> -> vector<8x256xf32>
    %39 = arith.addf %33, %38 : vector<8x256xf32>
    %c0_34 = arith.constant 0 : index
    %c0_35 = arith.constant 0 : index
    %c18 = arith.constant 18 : index
    %40 = vector.load %arg3[%c0_34, %c0_35, %c18] : memref<1x4x290xbf16, #tpu.memory_space<vmem>>, vector<1x4x256xbf16>
    %41 = vector.shape_cast %40 : vector<1x4x256xbf16> to vector<4x256xbf16>
    %c2_36 = arith.constant 2 : index
    %c0_37 = arith.constant 0 : index
    %42 = vector.load %arg2[%c2_36, %c0_37] : memref<3x256xbf16, #tpu.memory_space<vmem>>, vector<1x256xbf16>
    %43 = vector.broadcast %42 : vector<1x256xbf16> to vector<4x256xbf16>
    %44 = arith.mulf %41, %43 : vector<4x256xbf16>
    %c5 = arith.constant 5 : index
    %c0_38 = arith.constant 0 : index
    %c0_39 = arith.constant 0 : index
    %45 = vector.load %arg1[%c5, %c0_38, %c0_39] : memref<9x8x4xbf16, #tpu.memory_space<vmem>>, vector<1x8x4xbf16>
    %46 = vector.shape_cast %45 : vector<1x8x4xbf16> to vector<8x4xbf16>
    %cst_40 = arith.constant dense<0.000000e+00> : vector<8x256xf32>
    %47 = tpu.matmul %46, %44, %cst_40 {dimension_numbers = #tpu.dot_dimension_numbers<[1], [0], [0], [1], [0, 0, 1, 1], [], []>} : vector<8x4xbf16>, vector<4x256xbf16>, vector<8x256xf32> -> vector<8x256xf32>
    %48 = arith.addf %39, %47 : vector<8x256xf32>
    %c0_41 = arith.constant 0 : index
    %c0_42 = arith.constant 0 : index
    %c32 = arith.constant 32 : index
    %49 = vector.load %arg3[%c0_41, %c0_42, %c32] : memref<1x4x290xbf16, #tpu.memory_space<vmem>>, vector<1x4x256xbf16>
    %50 = vector.shape_cast %49 : vector<1x4x256xbf16> to vector<4x256xbf16>
    %c0_43 = arith.constant 0 : index
    %c0_44 = arith.constant 0 : index
    %51 = vector.load %arg2[%c0_43, %c0_44] : memref<3x256xbf16, #tpu.memory_space<vmem>>, vector<1x256xbf16>
    %52 = vector.broadcast %51 : vector<1x256xbf16> to vector<4x256xbf16>
    %53 = arith.mulf %50, %52 : vector<4x256xbf16>
    %c6 = arith.constant 6 : index
    %c0_45 = arith.constant 0 : index
    %c0_46 = arith.constant 0 : index
    %54 = vector.load %arg1[%c6, %c0_45, %c0_46] : memref<9x8x4xbf16, #tpu.memory_space<vmem>>, vector<1x8x4xbf16>
    %55 = vector.shape_cast %54 : vector<1x8x4xbf16> to vector<8x4xbf16>
    %cst_47 = arith.constant dense<0.000000e+00> : vector<8x256xf32>
    %56 = tpu.matmul %55, %53, %cst_47 {dimension_numbers = #tpu.dot_dimension_numbers<[1], [0], [0], [1], [0, 0, 1, 1], [], []>} : vector<8x4xbf16>, vector<4x256xbf16>, vector<8x256xf32> -> vector<8x256xf32>
    %57 = arith.addf %48, %56 : vector<8x256xf32>
    %c0_48 = arith.constant 0 : index
    %c0_49 = arith.constant 0 : index
    %c33 = arith.constant 33 : index
    %58 = vector.load %arg3[%c0_48, %c0_49, %c33] : memref<1x4x290xbf16, #tpu.memory_space<vmem>>, vector<1x4x256xbf16>
    %59 = vector.shape_cast %58 : vector<1x4x256xbf16> to vector<4x256xbf16>
    %c7 = arith.constant 7 : index
    %c0_50 = arith.constant 0 : index
    %c0_51 = arith.constant 0 : index
    %60 = vector.load %arg1[%c7, %c0_50, %c0_51] : memref<9x8x4xbf16, #tpu.memory_space<vmem>>, vector<1x8x4xbf16>
    %61 = vector.shape_cast %60 : vector<1x8x4xbf16> to vector<8x4xbf16>
    %cst_52 = arith.constant dense<0.000000e+00> : vector<8x256xf32>
    %62 = tpu.matmul %61, %59, %cst_52 {dimension_numbers = #tpu.dot_dimension_numbers<[1], [0], [0], [1], [0, 0, 1, 1], [], []>} : vector<8x4xbf16>, vector<4x256xbf16>, vector<8x256xf32> -> vector<8x256xf32>
    %63 = arith.addf %57, %62 : vector<8x256xf32>
    %c0_53 = arith.constant 0 : index
    %c0_54 = arith.constant 0 : index
    %c34 = arith.constant 34 : index
    %64 = vector.load %arg3[%c0_53, %c0_54, %c34] : memref<1x4x290xbf16, #tpu.memory_space<vmem>>, vector<1x4x256xbf16>
    %65 = vector.shape_cast %64 : vector<1x4x256xbf16> to vector<4x256xbf16>
    %c2_55 = arith.constant 2 : index
    %c0_56 = arith.constant 0 : index
    %66 = vector.load %arg2[%c2_55, %c0_56] : memref<3x256xbf16, #tpu.memory_space<vmem>>, vector<1x256xbf16>
    %67 = vector.broadcast %66 : vector<1x256xbf16> to vector<4x256xbf16>
    %68 = arith.mulf %65, %67 : vector<4x256xbf16>
    %c8 = arith.constant 8 : index
    %c0_57 = arith.constant 0 : index
    %c0_58 = arith.constant 0 : index
    %69 = vector.load %arg1[%c8, %c0_57, %c0_58] : memref<9x8x4xbf16, #tpu.memory_space<vmem>>, vector<1x8x4xbf16>
    %70 = vector.shape_cast %69 : vector<1x8x4xbf16> to vector<8x4xbf16>
    %cst_59 = arith.constant dense<0.000000e+00> : vector<8x256xf32>
    %71 = tpu.matmul %70, %68, %cst_59 {dimension_numbers = #tpu.dot_dimension_numbers<[1], [0], [0], [1], [0, 0, 1, 1], [], []>} : vector<8x4xbf16>, vector<4x256xbf16>, vector<8x256xf32> -> vector<8x256xf32>
    %72 = arith.addf %63, %71 : vector<8x256xf32>
    %c0_60 = arith.constant 0 : index
    %c0_61 = arith.constant 0 : index
    %c0_62 = arith.constant 0 : index
    %73 = vector.load %arg4[%c0_60, %c0_61, %c0_62] : memref<1x8x256xf32, #tpu.memory_space<vmem>>, vector<1x8x256xf32>
    %74 = vector.shape_cast %73 : vector<1x8x256xf32> to vector<8x256xf32>
    %75 = vector.shape_cast %72 : vector<8x256xf32> to vector<1x8x256xf32>
    tpu.vector_store %arg4[%c0_60, %c0_61, %c0_62], %75 {strides = array<i32>} : memref<1x8x256xf32, #tpu.memory_space<vmem>>, vector<1x8x256xf32>,
    return
  }
  func.func @transform_0(%arg0: i32) -> (i32, i32, i32) {
    %c0_i32 = arith.constant 0 : i32
    %c0_i32_0 = arith.constant 0 : i32
    %c0_i32_1 = arith.constant 0 : i32
    %c0_i32_2 = arith.constant 0 : i32
    return %c0_i32, %c0_i32_0, %c0_i32_1 : i32, i32, i32
  }
  func.func @transform_1(%arg0: i32) -> (i32, i32) {
    %c0_i32 = arith.constant 0 : i32
    %c0_i32_0 = arith.constant 0 : i32
    %c0_i32_1 = arith.constant 0 : i32
    return %c0_i32, %c0_i32_0 : i32, i32
  }
  func.func @transform_2(%arg0: i32) -> (i32, i32, i32) {
    %c0_i32 = arith.constant 0 : i32
    %c0_i32_0 = arith.constant 0 : i32
    %c0_i32_1 = arith.constant 0 : i32
    return %arg0, %c0_i32, %c0_i32_0 : i32, i32, i32
  }
  func.func @transform_3(%arg0: i32) -> (i32, i32, i32) {
    %c0_i32 = arith.constant 0 : i32
    %c0_i32_0 = arith.constant 0 : i32
    %c0_i32_1 = arith.constant 0 : i32
    return %arg0, %c0_i32, %c0_i32_0 : i32, i32, i32
  }
}

</mosaic_0001>

<bundles_post_ra>
// kernel: deconv_block_last.1
= control target key start
LH: loop header
LB: loop body
LE: loop exit
PB: predicated region body
PF: predicated region fallthrough
CT: control target
= control target key end

     0   :  { %s1152_s12 = smov 0   ;;  %s1283_s0 = inlined_call_operand.vmem [shape: bf16[9,8,4], index: 0, kind: input, shape index: {}]   ;;  %s1284_s1 = inlined_call_operand.vmem [shape: bf16[3,256], index: 1, kind: input, shape index: {}]   ;;  %s1285_s2 = inlined_call_operand.vmem [shape: bf16[2,4,290], index: 2, kind: input, shape index: {}]   ;;  %s1286_s3 = inlined_call_operand.vmem [shape: f32[2,8,256], index: 3, kind: output, shape index: {}]  }
   0x1 LB: > { %s1043_s13 = sadd.s32 4294967295, %s1115_s12   ;;  %p1047_p0 = scmp.ge.s32.totalorder %s1115_s12, 1  ;;  %s1115_s12 = sphi %s1152_s12, %s13_s12  }
   0x2   : > { %p137_p1 = scmp.lt.s32.totalorder %s1115_s12, 3 }
   0x4   : > { %p138_p2 = pnand %p1047_p0, %p137_p1 }
   0x5   : > { %p161_p3 = scmp.lt.s32.totalorder (!%p138_p2), %s1043_s13, 1  ;;  %s1118_s22 = smov (!%p138_p2), 18  }
   0x6   : > { %141 = sbr.rel (%p138_p2) target bundleno = 500 (0x1f4), region = 32  ;;  %s1119_s23 = smov (!%p138_p2), 2  }
   0x7   : > { %s1120_s24 = smov (!%p138_p2), 32   ;;  %s1121_s25 = smov (!%p138_p2), 16  }
   0x8   : > { %s1122_s26 = smov (!%p138_p2), 34   ;;  %s1123_s27 = smov (!%p138_p2), 127  }
   0x9   : > { %s1124_s28 = smov (!%p138_p2), 111   ;;  %s1126_s4 = smov (!%p138_p2), 126  }
   0xa   : > { %s1127_s5 = smov (!%p138_p2), 96   ;;  %s1128_s6 = smov (!%p138_p2), 112  }
   0xb   : > { %v186_v0 = vlaneseq  ;;  %v1057_v1 = vld.sshfl [vmem:[%s1284_s1] sm:$0x22 pattern:$0x76325410]  ;;  %v1117_v2 = vmov 1983009808  }
   0xc   : > { %v201_v3 = vunpack.c.l.s4 %v1117_v2  ;;  %v360_v4 = vcombine.high %v1057_v1, %v1057_v1  ;;  %v1051_v5 = vld.sshfl [vmem:[%s1284_s1] sm:$0x11 pattern:$0x76325410]  ;;  %v362_v7 = vpack.i.b16 %v1057_v1, %v1057_v1  ;;  %s1288_s13 = smov (!%p161_p3, %s1043_s13), 1  ;;  %vm243_vm0 = vcmask 1041408  }
   0xd   : > { %v187_v6 = vshrl.u32 %v186_v0, 7  ;;  %v182_v8 = vcombine.high %v1051_v5, %v1051_v5  ;;  %v184_v9 = vpack.i.b16 %v1051_v5, %v1051_v5  ;;  %s1082_s18 = smul.u32 6, %s1288_s13  ;;  %v1125_v38 = vmov 0   ;;  %v209_v44 = vld [vmem:[%s1283_s0] sm:$0xf]  ;;  %s1129_s9 = smov 110  }
   0xe   : > { %v202_v10 = vunpack.c.0.s8 %v201_v3  ;;  %v369_v11 = vpack.i.b16 %v360_v4, %v360_v4  ;;  %282 = vmatprep.mubr.bf16.mxu0 %v1125_v38  ;;  %341 = vmatprep.mubr.bf16.mxu1 %v1125_v38  ;;  %vm388_vm1 = vcmask 15360   ;;  %vm239_vm2 = vcmask 31744   ;;  %s1130_s10 = smov 95   ;;  %s1131_s11 = smov 94  }
   0xf   : > { %v366_v12 = vsub.s32 1, %v187_v6  ;;  %v188_v13 = vsub.s32 0, %v187_v6  ;;  %v191_v14 = vpack.i.b16 %v182_v8, %v182_v8  ;;  %s1175_s21 = scalar_lea.vmem %s1285_s2, %s1082_s18  ;;  %vm645_vm3 = vcmask 146432  }
  0x10   : > { %v1166_v15 = vsub.s32 %v202_v10, %v187_v6  ;;  %v210_v24 = vld [vmem:[%s1175_s21] sm:$0x3f]  ;;  %vm733_vm4 = vcmask 261120   ;;  %vm476_vm5 = vcmask 130048   ;;  %vm236_vm6 = vcmask 1039360  }
  0x11   : > { %v367_v16 = vrot.slane %v362_v7, %v366_v12  ;;  %v374_v17 = vrot.slane %v369_v11, %v366_v12  ;;  %v189_v18 = vrot.slane %v184_v9, %v188_v13  ;;  %v196_v19 = vrot.slane %v191_v14, %v188_v13  ;;  %v560_v27 = vld [vmem:[%s1175_s21] sm:$0x3f] }
  0x12   : > { %v221_v25 = vrot.slane %v210_v24, %v1166_v15  ;;  %v214_v26 = vcombine.high %v210_v24, %v210_v24  ;;  %v571_v30 = vrot.slane %v560_v27, %v1166_v15  ;;  %v564_v31 = vcombine.high %v560_v27, %v560_v27  ;;  %v172_v34 = vld [vmem:[%s1175_s21] sm:$0xf]  ;;  %v1052_v11 = vld [vmem:[%s1283_s0 + $0x4] sm:$0xf] }
  0x13   : > { %v377_v20 = vcombine.low %v367_v16, %v374_v17  ;;  %v199_v21 = vcombine.low %v189_v18, %v196_v19  ;;  %v350_v42 = vld [vmem:[%s1175_s21] sm:$0x3f]  ;;  %vm902_vm7 = vcmask 277504   ;;  %vm417_vm8 = vcmask 1031168  }
  0x14   : > { %v229_v28 = vcombine.high %v221_v25, %v221_v25  ;;  %v228_v29 = vrot.slane %v214_v26, %v1166_v15  ;;  %v579_v32 = vcombine.high %v571_v30, %v571_v30  ;;  %v578_v33 = vrot.slane %v564_v31, %v1166_v15  ;;  %v729_v50 = vld [vmem:[%s1175_s21] sm:$0x3f] }
  0x15   : > { %v384_v22 = vrot.slane %v377_v20, %v1166_v15  ;;  %v206_v23 = vrot.slane %v199_v21, %v1166_v15  ;;  %v472_v52 = vld [vmem:[%s1175_s21] sm:$0x3f]  ;;  %vm586_vm9 = vcmask 908288   ;;  %vm505_vm10 = vcmask 916480  }
  0x16   : > { %v641_v55 = vld [vmem:[%s1175_s21] sm:$0x3f]  ;;  %vm674_vm11 = vcmask 900096   ;;  %vm762_vm12 = vcmask 785408   ;;  %vm843_vm13 = vcmask 777216   ;;  %vm931_vm14 = vcmask 769024  }
  0x17   : > { %642 = vrot.lane.b32.xlu1 %v384_v22, %s1118_s22  ;;  %385 = vrot.lane.b32.xlu0 %v384_v22, %s1119_s23  ;;  %v208_v35 = vmul.bf16 %v206_v23, %v172_v34  ;;  %v817_v5 = vld [vmem:[%s1175_s21] sm:$0x3f] }
  0x18   : > { %v828_v12 = vrot.slane %v817_v5, %v1166_v15  ;;  %v898_v20 = vld [vmem:[%s1175_s21] sm:$0x3f] }
  0x19   : > { %v298_v36 = vrot.slane %v208_v35, %v1166_v15 }
  0x1a   : > { %v836_v17 = vcombine.high %v828_v12, %v828_v12 }
  0x1b   : > { %730 = vrot.lane.b32.xlu1 %v206_v23, %s1120_s24  ;;  %473 = vrot.lane.b32.xlu0 %v206_v23, %s1121_s25  ;;  %v299_v37 = vcombine.high %v298_v36, %v298_v36  ;;  %v304_v39 = vsel %vm243_vm0, %v298_v36, 0 }
  0x1d   : > { %1055 = vmatprep.subr.msk.bf16.mxu1 %vm243_vm0, %v299_v37 }
  0x1e   : > { %324 = vmatpush1.bf16.msra.mxu1 %v304_v39 }
  0x1f   : > { %899 = vrot.lane.b32.xlu0 %v384_v22, %s1122_s26  ;;  %230 = vrot.lane.b32.xlu1 %v221_v25, %s1123_s27 }
  0x21   : > { %1056 = vmatmul.mubr.msk.bf16.vlgmr.msra.gmra.mxu1 %vm239_vm2, %v209_v44 }
  0x22   : > { %549 = vmatprep.mubr.bf16.mxu1 %v1125_v38 }
  0x23   : > { %232 = vrot.lane.b32.xlu0 %v229_v28, %s1123_s27  ;;  %234 = vrot.lane.b32.xlu1 %v228_v29, %s1123_s27 }
  0x27   : > { %580 = vrot.lane.b32.xlu0 %v571_v30, %s1124_s28  ;;  %582 = vrot.lane.b32.xlu1 %v579_v32, %s1124_s28  ;;  %v821_v30 = vcombine.high %v817_v5, %v817_v5 }
  0x2b   : > { %584 = vrot.lane.b32.xlu0 %v578_v33, %s1124_s28  ;;  %v835_v33 = vrot.slane %v821_v30, %v1166_v15  ;;  %s1081_s28 = sshll.u32 %s1288_s13, 4 }
  0x89   : > { %v643_v40 = vpop.permute.xlu1 %642  ;;  %v386_v41 = vpop.permute.xlu0 %385 }
  0x8a   : > { %v387_v43 = vrot.slane %v386_v41, 6  ;;  %v644_v45 = vrot.slane %v643_v40, 6 }
  0x8c   : > { %v389_v46 = vsel %vm388_vm1, %v387_v43, %v386_v41  ;;  %v646_v56 = vsel %vm645_vm3, %v644_v45, %v643_v40 }
  0x8d   : > { %v391_v47 = vmul.bf16 %v389_v46, %v350_v42  ;;  %v731_v48 = vpop.permute.xlu1 %730  ;;  %v474_v49 = vpop.permute.xlu0 %473  ;;  %v648_v63 = vmul.bf16 %v646_v56, %v641_v55 }
  0x8e   : > { %v732_v51 = vrot.slane %v731_v48, 6  ;;  %v475_v53 = vrot.slane %v474_v49, 6 }
  0x8f   : > { %v402_v54 = vrot.slane %v391_v47, %v1166_v15  ;;  %v395_v0 = vcombine.high %v391_v47, %v391_v47  ;;  %v659_v9 = vrot.slane %v648_v63, %v1166_v15  ;;  %v652_v22 = vcombine.high %v648_v63, %v648_v63 }
  0x90   : > { %v734_v57 = vsel %vm733_vm4, %v732_v51, %v731_v48  ;;  %v477_v58 = vsel %vm476_vm5, %v475_v53, %v474_v49  ;;  %v1058_v51 = vld [vmem:[%s1283_s0 + $0x8] sm:$0xf] }
  0x91   : > { %v736_v59 = vmul.bf16 %v734_v57, %v729_v50  ;;  %v479_v60 = vmul.bf16 %v477_v58, %v472_v52  ;;  %411 = vrot.lane.b32.xlu0 %v402_v54, %s1126_s4  ;;  %v900_v61 = vpop.permute.xlu0 %899  ;;  %v231_v62 = vpop.permute.xlu1 %230  ;;  %v409_v8 = vrot.slane %v395_v0, %v1166_v15  ;;  %v410_v16 = vcombine.high %v402_v54, %v402_v54  ;;  %v1061_v57 = vld [vmem:[%s1283_s0 + $0xc] sm:$0xf] }
  0x92   : > { %v901_v18 = vrot.slane %v900_v61, 6  ;;  %v667_v24 = vcombine.high %v659_v9, %v659_v9  ;;  %v666_v27 = vrot.slane %v652_v22, %v1166_v15 }
  0x93   : > { %v747_v1 = vrot.slane %v736_v59, %v1166_v15  ;;  %v490_v2 = vrot.slane %v479_v60, %v1166_v15  ;;  %v483_v13 = vcombine.high %v479_v60, %v479_v60  ;;  %v740_v23 = vcombine.high %v736_v59, %v736_v59 }
  0x94   : > { %v903_v21 = vsel %vm902_vm7, %v901_v18, %v900_v61  ;;  %v1064_v61 = vld [vmem:[%s1283_s0 + $0x10] sm:$0xf] }
  0x95   : > { %756 = vrot.lane.b32.xlu0 %v747_v1, %s1127_s5  ;;  %499 = vrot.lane.b32.xlu1 %v490_v2, %s1128_s6  ;;  %v233_v3 = vpop.permute.xlu0 %232  ;;  %v235_v4 = vpop.permute.xlu1 %234  ;;  %v498_v14 = vcombine.high %v490_v2, %v490_v2  ;;  %v497_v19 = vrot.slane %v483_v13, %v1166_v15  ;;  %v905_v25 = vmul.bf16 %v903_v21, %v898_v20  ;;  %v1067_v2 = vld [vmem:[%s1283_s0 + $0x14] sm:$0xf]  ;;  %v1073_v13 = vld [vmem:[%s1283_s0 + $0x1c] sm:$0xf] }
  0x96   : > { %v238_v6 = vsel %vm236_vm6, %v233_v3, %v235_v4  ;;  %v237_v7 = vsel %vm236_vm6, %v231_v62, %v233_v3  ;;  %v754_v26 = vrot.slane %v740_v23, %v1166_v15  ;;  %v755_v31 = vcombine.high %v747_v1, %v747_v1  ;;  %v1076_v20 = vld [vmem:[%s1283_s0 + $0x20] sm:$0xf] }
  0x97   : > { %1053 = vmatprep.subr.msk.bf16.mxu0 %vm243_vm0, %v238_v6  ;;  %v245_v10 = vsel %vm243_vm0, %v237_v7, 0  ;;  %v909_v28 = vcombine.high %v905_v25, %v905_v25  ;;  %v916_v29 = vrot.slane %v905_v25, %v1166_v15 }
  0x98   : > { %265 = vmatpush1.bf16.msra.mxu0 %v245_v10 }
  0x99   : > { %415 = vrot.lane.b32.xlu0 %v409_v8, %s1126_s4  ;;  %668 = vrot.lane.b32.xlu1 %v659_v9, %s1129_s9  ;;  %v923_v32 = vrot.slane %v909_v28, %v1166_v15  ;;  %v924_v34 = vcombine.high %v916_v29, %v916_v29  ;;  %v581_v35 = vpop.permute.xlu0 %580  ;;  %v583_v37 = vpop.permute.xlu1 %582  ;;  %v1070_v9 = vld [vmem:[%s1283_s0 + $0x18] sm:$0xf] }
  0x9a   : > { %v587_v48 = vsel %vm586_vm9, %v581_v35, %v583_v37 }
  0x9b   : > { %1054 = vmatmul.mubr.msk.bf16.vlgmr.msra.gmra.mxu0 %vm239_vm2, %v1052_v11  ;;  %v593_v55 = vsel %vm243_vm0, %v587_v48, 0 }
  0x9c   : > { %461 = vmatprep.mubr.bf16.mxu0 %v1125_v38 }
  0x9d   : > { %501 = vrot.lane.b32.xlu0 %v498_v14, %s1128_s6  ;;  %413 = vrot.lane.b32.xlu1 %v410_v16, %s1126_s4  ;;  %v585_v36 = vpop.permute.xlu0 %584  ;;  %s170_s4 = scalar_lea.vmem %s1286_s3, %s1081_s28 }
  0x9e   : > { %v588_v49 = vsel %vm586_vm9, %v583_v37, %v585_v36 }
  0xa1   : > { %839 = vrot.lane.b32.xlu0 %v836_v17, %s1130_s10  ;;  %503 = vrot.lane.b32.xlu1 %v497_v19, %s1128_s6 }
  0xa5   : > { %670 = vrot.lane.b32.xlu0 %v667_v24, %s1129_s9  ;;  %837 = vrot.lane.b32.xlu1 %v828_v12, %s1130_s10 }
  0xa9   : > { %760 = vrot.lane.b32.xlu0 %v754_v26, %s1127_s5  ;;  %672 = vrot.lane.b32.xlu1 %v666_v27, %s1129_s9 }
  0xad   : > { %925 = vrot.lane.b32.xlu0 %v916_v29, %s1131_s11  ;;  %758 = vrot.lane.b32.xlu1 %v755_v31, %s1127_s5 }
  0xb1   : > { %929 = vrot.lane.b32.xlu0 %v923_v32, %s1131_s11  ;;  %841 = vrot.lane.b32.xlu1 %v835_v33, %s1130_s10 }
  0xb5   : > { %927 = vrot.lane.b32.xlu1 %v924_v34, %s1131_s11 }
  0xe1   : > { %v343_v21 = vpop.f32.mrf.mxu1 }
  0xe3   : > { %v345_v22 = vpop.f32.mrf.mxu1 }
 0x103   : > { %v412_v39 = vpop.permute.xlu0 %411 }
 0x107   : > { %v757_v40 = vpop.permute.xlu0 %756  ;;  %v500_v41 = vpop.permute.xlu1 %499 }
 0x10b   : > { %v416_v42 = vpop.permute.xlu0 %415  ;;  %v669_v43 = vpop.permute.xlu1 %668 }
 0x10f   : > { %v502_v44 = vpop.permute.xlu0 %501  ;;  %v414_v45 = vpop.permute.xlu1 %413 }
 0x110   : > { %v418_v46 = vsel %vm417_vm8, %v412_v39, %v414_v45  ;;  %v419_v47 = vsel %vm417_vm8, %v414_v45, %v416_v42  ;;  %v506_v50 = vsel %vm505_vm10, %v500_v41, %v502_v44 }
 0x111   : > { %v424_v15 = vsel %vm243_vm0, %v418_v46, 0  ;;  %1059 = vmatprep.subr.msk.bf16.mxu0 %vm243_vm0, %v419_v47  ;;  %v512_v56 = vsel %vm243_vm0, %v506_v50, 0 }
 0x112   : > { %444 = vmatpush1.bf16.msra.mxu0 %v424_v15 }
 0x113   : > { %v840_v52 = vpop.permute.xlu0 %839  ;;  %1065 = vmatprep.subr.msk.bf16.mxu0 %vm243_vm0, %v588_v49  ;;  %v504_v53 = vpop.permute.xlu1 %503 }
 0x114   : > { %v507_v54 = vsel %vm505_vm10, %v502_v44, %v504_v53 }
 0x115   : > { %1060 = vmatmul.mubr.msk.bf16.vlgmr.msra.gmra.mxu0 %vm239_vm2, %v1058_v51  ;;  %1062 = vmatprep.subr.msk.bf16.mxu1 %vm243_vm0, %v507_v54 }
 0x116   : > { %532 = vmatpush1.bf16.msra.mxu1 %v512_v56  ;;  %613 = vmatpush1.bf16.msra.mxu0 %v593_v55 }
 0x117   : > { %v671_v58 = vpop.permute.xlu0 %670  ;;  %v838_v59 = vpop.permute.xlu1 %837  ;;  %630 = vmatprep.mubr.bf16.mxu0 %v1125_v38 }
 0x118   : > { %v675_v60 = vsel %vm674_vm11, %v669_v43, %v671_v58  ;;  %v844_v8 = vsel %vm843_vm13, %v838_v59, %v840_v52 }
 0x119   : > { %1063 = vmatmul.mubr.msk.bf16.vlgmr.msra.gmra.mxu1 %vm239_vm2, %v1061_v57  ;;  %v681_v1 = vsel %vm243_vm0, %v675_v60, 0  ;;  %v850_v12 = vsel %vm243_vm0, %v844_v8, 0 }
 0x11a   : > { %718 = vmatprep.mubr.bf16.mxu1 %v1125_v38 }
 0x11b   : > { %v761_v62 = vpop.permute.xlu0 %760  ;;  %v673_v63 = vpop.permute.xlu1 %672 }
 0x11c   : > { %v676_v0 = vsel %vm674_vm11, %v671_v58, %v673_v63 }
 0x11d   : > { %1066 = vmatmul.mubr.msk.bf16.vlgmr.msra.gmra.mxu0 %vm239_vm2, %v1064_v61  ;;  %1068 = vmatprep.subr.msk.bf16.mxu1 %vm243_vm0, %v676_v0 }
 0x11e   : > { %701 = vmatpush1.bf16.msra.mxu1 %v681_v1  ;;  %806 = vmatprep.mubr.bf16.mxu0 %v1125_v38 }
 0x11f   : > { %v759_v3 = vpop.permute.xlu1 %758  ;;  %v926_v6 = vpop.permute.xlu0 %925 }
 0x120   : > { %v763_v4 = vsel %vm762_vm12, %v757_v40, %v759_v3  ;;  %v764_v5 = vsel %vm762_vm12, %v759_v3, %v761_v62 }
 0x121   : > { %v769_v7 = vsel %vm243_vm0, %v763_v4, 0  ;;  %1069 = vmatmul.mubr.msk.bf16.vlgmr.msra.gmra.mxu1 %vm239_vm2, %v1067_v2  ;;  %1071 = vmatprep.subr.msk.bf16.mxu0 %vm243_vm0, %v764_v5 }
 0x122   : > { %789 = vmatpush1.bf16.msra.mxu0 %v769_v7  ;;  %887 = vmatprep.mubr.bf16.mxu1 %v1125_v38 }
 0x123   : > { %v842_v10 = vpop.permute.xlu1 %841  ;;  %v930_v14 = vpop.permute.xlu0 %929 }
 0x124   : > { %v845_v11 = vsel %vm843_vm13, %v840_v52, %v842_v10 }
 0x125   : > { %1072 = vmatmul.mubr.msk.bf16.vlgmr.msra.gmra.mxu0 %vm239_vm2, %v1070_v9  ;;  %1074 = vmatprep.subr.msk.bf16.mxu1 %vm243_vm0, %v845_v11 }
 0x126   : > { %870 = vmatpush1.bf16.msra.mxu1 %v850_v12  ;;  %975 = vmatprep.mubr.bf16.mxu0 %v1125_v38  ;;  %v347_v38 = vpop.f32.mrf.mxu1 }
 0x127   : > { %v928_v16 = vpop.permute.xlu1 %927 }
 0x128   : > { %v932_v17 = vsel %vm931_vm14, %v926_v6, %v928_v16  ;;  %v933_v18 = vsel %vm931_vm14, %v928_v16, %v930_v14  ;;  %v348_v23 = vpop.f32.mrf.mxu1 }
 0x129   : > { %v938_v19 = vsel %vm243_vm0, %v932_v17, 0  ;;  %1075 = vmatmul.mubr.msk.bf16.vlgmr.msra.gmra.mxu1 %vm239_vm2, %v1073_v13  ;;  %1077 = vmatprep.subr.msk.bf16.mxu0 %vm243_vm0, %v933_v18 }
 0x12a   : > { %958 = vmatpush1.bf16.msra.mxu0 %v938_v19 }
 0x12d   : > { %1078 = vmatmul.mubr.msk.bf16.vlgmr.msra.gmra.mxu0 %vm239_vm2, %v1076_v20 }
 0x15b   : > { %v284_v24 = vpop.f32.mrf.mxu0 }
 0x15c   : > { %v344_v25 = vadd.f32 %v343_v21, %v284_v24 }
 0x15d   : > { %v286_v26 = vpop.f32.mrf.mxu0 }
 0x15e   : > { %v346_v27 = vadd.f32 %v345_v22, %v286_v26 }
 0x15f   : > { %v288_v28 = vpop.f32.mrf.mxu0 }
 0x161   : > { %v289_v29 = vpop.f32.mrf.mxu0 }
 0x1d5   : > { %v463_v30 = vpop.f32.mrf.mxu0 }
 0x1d6   : > { %v470_v43 = vadd.f32 %v463_v30, %v344_v25 }
 0x1d7   : > { %v465_v31 = vpop.f32.mrf.mxu0 }
 0x1d8   : > { %v471_v46 = vadd.f32 %v465_v31, %v346_v27 }
 0x1d9   : > { %v467_v32 = vpop.f32.mrf.mxu0  ;;  %v551_v33 = vpop.f32.mrf.mxu1 }
 0x1da   : > { %v558_v47 = vadd.f32 %v551_v33, %v470_v43 }
 0x1db   : > { %v468_v34 = vpop.f32.mrf.mxu0  ;;  %v553_v35 = vpop.f32.mrf.mxu1 }
 0x1dc   : > { %v559_v49 = vadd.f32 %v553_v35, %v471_v46 }
 0x1dd   : > { %v555_v36 = vpop.f32.mrf.mxu1  ;;  %v632_v37 = vpop.f32.mrf.mxu0 }
 0x1de   : > { %v639_v50 = vadd.f32 %v632_v37, %v558_v47 }
 0x1df   : > { %v556_v39 = vpop.f32.mrf.mxu1  ;;  %v634_v40 = vpop.f32.mrf.mxu0 }
 0x1e0   : > { %v640_v53 = vadd.f32 %v634_v40, %v559_v49 }
 0x1e1   : > { %v636_v41 = vpop.f32.mrf.mxu0  ;;  %v720_v42 = vpop.f32.mrf.mxu1 }
 0x1e2   : > { %v727_v54 = vadd.f32 %v720_v42, %v639_v50 }
 0x1e3   : > { %v637_v44 = vpop.f32.mrf.mxu0  ;;  %v722_v45 = vpop.f32.mrf.mxu1 }
 0x1e4   : > { %v728_v57 = vadd.f32 %v722_v45, %v640_v53 }
 0x1e5   : > { %v724_v15 = vpop.f32.mrf.mxu1  ;;  %v808_v48 = vpop.f32.mrf.mxu0 }
 0x1e6   : > { %v815_v58 = vadd.f32 %v808_v48, %v727_v54 }
 0x1e7   : > { %v725_v51 = vpop.f32.mrf.mxu1  ;;  %v810_v52 = vpop.f32.mrf.mxu0 }
 0x1e8   : > { %v816_v61 = vadd.f32 %v810_v52, %v728_v57 }
 0x1e9   : > { %v812_v55 = vpop.f32.mrf.mxu0  ;;  %v889_v56 = vpop.f32.mrf.mxu1 }
 0x1ea   : > { %v896_v62 = vadd.f32 %v889_v56, %v815_v58 }
 0x1eb   : > { %v813_v59 = vpop.f32.mrf.mxu0  ;;  %v891_v60 = vpop.f32.mrf.mxu1 }
 0x1ec   : > { %v897_v1 = vadd.f32 %v891_v60, %v816_v61 }
 0x1ed   : > { %v977_v63 = vpop.f32.mrf.mxu0  ;;  %v893_v0 = vpop.f32.mrf.mxu1 }
 0x1ee   : > { %v984_v2 = vadd.f32 %v977_v63, %v896_v62 }
 0x1ef   : > { %v979_v3 = vpop.f32.mrf.mxu0  ;;  %v894_v4 = vpop.f32.mrf.mxu1 }
 0x1f0   : > { %986 = vst [vmem:[%s170_s4] sm:$0xff] %v984_v2  ;;  %v985_v5 = vadd.f32 %v979_v3, %v897_v1 }
 0x1f1   : > { %v981_v6 = vpop.f32.mrf.mxu0 }
 0x1f2   : > { %987 = vst [vmem:[%s170_s4 + $0x8] sm:$0xff] %v985_v5 }
 0x1f3   : > { %v982_v7 = vpop.f32.mrf.mxu0 }
 0x1f4 PF: > { %s13_s12 = sadd.s32 1, %s1115_s12  }
 0x1f5   : > { %p10_p4 = scmp.ge.s32.totalorder %s13_s12, 4  }
 0x1f7   :  { %12 = sbr.rel (!%p10_p4) target bundleno = 1 (0x1), region = 70 }

</bundles_post_ra>
